<compile_context>
chip_gen: v7x
topology: tpu7x:2x2x1
jax: 0.10.0
libtpu: 0.0.40
codegen_flags: <defaults>
</compile_context>

<pallas_src>
import functools

import numpy as np
import jax
import jax.numpy as jnp
from jax.experimental import pallas as pl
from jax.experimental.pallas import tpu as pltpu


def edm_task1_kernel(idx_ref, x_ref, wb_ref, out_ref, *,
                     block_b, num_object, num_action, num_classes,
                     logit_threshold):
    Bb = block_b
    O, A, C = num_object, num_action, num_classes
    OA = O + A
    M = x_ref.shape[1]
    D = x_ref.shape[2]
    R = Bb * M

    packed = idx_ref[...]                                    # (Bb, M, A+1) int32
    # Lanes 0..A-1: action-target class index with the object mask already
    # folded in by the wrapper (-1 == masked-out or no target).  Lane A: the
    # {0,1} object mask (needed only for the mean pool).
    aaidx = packed[:, :, :A].reshape(R, A)                   # (R, A)
    m3 = packed[:, :, A:A + 1].astype(jnp.float32)           # (Bb, M, 1)

    x3 = x_ref[...]                                          # (Bb, M, D) f32

    # Masked mean-pool over objects -> input rows for the "does not exist"
    # head.  pl.reciprocal keeps the divide off the VALU path.  (Upstream
    # guarantees >= 1 valid object per batch row, matching the reference's
    # divide.)
    msum = jnp.sum(m3, axis=1)                                          # (Bb, 1)
    pooled = jnp.sum(x3 * m3, axis=1) * pl.reciprocal(msum, approx=False)  # (Bb, D)

    x2d = x3.reshape(R, D)

    wb = wb_ref[...]                                         # (D+1, O+A+C)
    w = wb[:D, :]                                            # (D, O+A+C)
    b = wb[D:D + 1, :]                                       # (1, O+A+C)

    # Two MXU pushes against the resident weights: the per-object rows only
    # need the object+action columns, the pooled rows only the "not exist"
    # columns.  No row-concatenate copy, no padding of a non-aligned row
    # count, and the second push computes 60% fewer columns.
    po = (jnp.dot(x2d, w[:, :OA], preferred_element_type=jnp.float32)
          + b[:, :OA])                                       # (R, O+A)
    non_exist = (jnp.dot(pooled, w[:, OA:], preferred_element_type=jnp.float32)
                 + b[:, OA:])                                # (Bb, C)

    act = po[:, O:OA]                                        # (R, A)

    # is_eval=False selection: sigmoid(act) > thres  <=>  act > logit(thres);
    # the object-mask term is already folded into aaidx (-1) by the wrapper.
    selected = (act > logit_threshold) & (aaidx != -1)       # (R, A)

    # Scatter-max of the selected action logits into class bins.  Static
    # unroll over the (small) action axis keeps everything 2-D with the class
    # axis in lanes; one grouped sublane max per batch element.  The zero fill
    # for unselected slots reproduces the torch diag(logit) @ one_hot trick
    # exactly (the eps=-10000 sentinel never survives there either).
    cls = jax.lax.broadcasted_iota(jnp.int32, (R, C), 1)     # (R, C)
    best = jnp.full((R, C), -jnp.inf, dtype=jnp.float32)
    for a in range(A):                                       # A static & small
        match = selected[:, a:a + 1] & (aaidx[:, a:a + 1] == cls)
        best = jnp.maximum(best, jnp.where(match, act[:, a:a + 1], 0.0))
    mapped = jnp.max(best.reshape(Bb, M, C), axis=1)         # (Bb, C)

    final = jnp.where(mapped != 0.0, mapped, non_exist)      # (Bb, C)

    # Single fused output slab: rows 0..M-1 = per-object [obj|act] logits,
    # row M = per-batch final class logits.
    out_ref[:, :M, :OA] = po.reshape(Bb, M, OA)
    out_ref[:, M:M + 1, :C] = final.reshape(Bb, 1, C)


def _detect_num_tensorcores():
    """Best-effort TensorCores-per-chip (v7x: 2, v5e/v6e: 1).  Any failure
    falls back to 1, which is always correct (merely not maximally parallel
    on v7x)."""
    try:
        info = pltpu.get_tpu_info()
        for attr in ("num_tensorcores", "tensorcore_count",
                     "num_tensor_cores", "tensorcores_per_chip"):
            v = getattr(info, attr, None)
            if v is not None:
                try:
                    v = int(v)
                except Exception:
                    continue
                if v >= 1:
                    return 2 if v >= 2 else 1
        cv = getattr(info, "chip_version", None)
        if cv is not None and "7" in str(cv):
            return 2
    except Exception:
        pass
    try:
        if "v7" in jax.devices()[0].device_kind.lower():
            return 2
    except Exception:
        pass
    return 1


def _pick_batch_block(B, M, *, num_cores=1, target_rows=256):
    """Batch elements per grid step.

    Single-TensorCore parts (v5e/v6e): the grid is a sequential loop, each
    step costs ~0.35us of fixed overhead, and the footprint is tens of KB, so
    one step (Bb=B) is best unless the per-step row count is huge.  On v7x the
    step count should be an exact multiple of the TensorCore count so the
    "parallel" axis shards evenly and no core idles on a tail step.
    """
    divisors = [d for d in range(1, B + 1) if B % d == 0]
    if num_cores > 1:
        pref = [bb for bb in divisors if (B // bb) % num_cores == 0]
        if pref:
            divisors = pref
    ok = [bb for bb in divisors if bb * M <= max(target_rows, M)]
    return max(ok) if ok else min(divisors)


def prepare_params(params):
    """One-time fusion of the three heads into a single (D+1, O+A+C) operand
    (weights, with the fused bias appended as the last row).  Done at
    parameter-setup time so no concatenates sit on the per-call hot path."""
    w = jnp.concatenate([params["w_obj"], params["w_act"], params["w_ne"]],
                        axis=1)                               # (D, O+A+C)
    b = jnp.concatenate([params["b_obj"], params["b_act"], params["b_ne"]],
                        axis=1)                               # (1, O+A+C)
    return jnp.concatenate([w, b], axis=0)                    # (D+1, O+A+C)


@functools.partial(
    jax.jit,
    static_argnames=("num_object", "num_action", "num_classes",
                     "act_threshold", "num_cores", "target_rows"))
def edm_task1_forward(inp, objmask, aaidx_tgts, wb, *, num_object, num_action,
                      num_classes, act_threshold, num_cores=1,
                      target_rows=256):
    B, M, D = inp.shape
    O, A, C = num_object, num_action, num_classes
    OA, OAC = O + A, O + A + C
    W = max(OA, C)

    Bb = _pick_batch_block(B, M, num_cores=num_cores, target_rows=target_rows)
    steps = B // Bb

    # Wrapper-side prep (all fused under this jit): fold the object mask into
    # the target indices and pack the {0,1} mask as one extra integer lane so
    # the kernel needs a single small integer input stream.
    mask_i = (objmask > 0).astype(jnp.int32)                  # (B, M)
    aa = jnp.where(mask_i.reshape(B, M, 1) > 0,
                   aaidx_tgts.reshape(B, M, A).astype(jnp.int32), -1)
    packed_idx = jnp.concatenate([aa, mask_i.reshape(B, M, 1)], axis=-1)

    # sigmoid(x) > t  <=>  x > log(t / (1 - t))   (t in (0, 1), static)
    logit_threshold = float(np.log(act_threshold / (1.0 - act_threshold)))

    kernel = functools.partial(
        edm_task1_kernel,
        block_b=Bb, num_object=O, num_action=A, num_classes=C,
        logit_threshold=logit_threshold)

    flops = 2 * B * M * D * OA + 2 * B * D * C
    bytes_accessed = 4 * (B * M * (A + 1) + B * M * D
                          + steps * (D + 1) * OAC + B * (M + 1) * W)

    grid_spec = pltpu.PrefetchScalarGridSpec(
        num_scalar_prefetch=0,
        grid=(steps,),
        in_specs=[
            pl.BlockSpec((Bb, M, A + 1), lambda i: (i, 0, 0)),  # idx+mask (int32)
            pl.BlockSpec((Bb, M, D), lambda i: (i, 0, 0)),      # inp
            pl.BlockSpec((D + 1, OAC), lambda i: (0, 0)),       # fused W|b (grid-invariant)
        ],
        out_specs=pl.BlockSpec((Bb, M + 1, W), lambda i: (i, 0, 0)),
    )

    slab = pl.pallas_call(
        kernel,
        out_shape=jax.ShapeDtypeStruct((B, M + 1, W), jnp.float32),
        grid_spec=grid_spec,
        compiler_params=pltpu.CompilerParams(
            dimension_semantics=("parallel",)),
        cost_estimate=pl.CostEstimate(flops=flops, transcendentals=0,
                                      bytes_accessed=bytes_accessed),
    )(packed_idx, inp, wb)

    # Lazy splits of the fused slab; fused into the surrounding jit.
    return {
        "final_outputs": slab[:, M, :C],
        "perobj_object": slab[:, :M, :O],
        "perobj_action": slab[:, :M, O:OA],
    }


def make_params(key, input_dim, num_object, num_action, num_classes):
    ks = jax.random.split(key, 6)
    s = 0.1
    return dict(
        w_obj=jax.random.normal(ks[0], (input_dim, num_object), jnp.float32) * s,
        b_obj=jax.random.normal(ks[1], (1, num_object), jnp.float32) * s,
        w_act=jax.random.normal(ks[2], (input_dim, num_action), jnp.float32) * s,
        b_act=jax.random.normal(ks[3], (1, num_action), jnp.float32) * s,
        w_ne=jax.random.normal(ks[4], (input_dim, num_classes), jnp.float32) * s,
        b_ne=jax.random.normal(ks[5], (1, num_classes), jnp.float32) * s,
    )


def edm_task1_reference(inp, objmask, aaidx_tgts, params, *, act_threshold):
    """Pure-JAX mirror of the PyTorch forward (is_eval=False)."""
    B, M, D = inp.shape
    A = params["w_act"].shape[1]
    C = params["w_ne"].shape[1]
    masked = inp * objmask[:, :, None]
    pooled = masked.sum(axis=1) / objmask.sum(axis=1, keepdims=True)
    non_exist = pooled @ params["w_ne"] + params["b_ne"]
    obj_out = inp @ params["w_obj"] + params["b_obj"]
    act_out = inp @ params["w_act"] + params["b_act"]
    N = M * A
    exp_mask = jnp.broadcast_to(objmask[:, :, None], (B, M, A)).reshape(B, N)
    act_flat = act_out.reshape(B, N)
    aaidx = aaidx_tgts.reshape(B, N)
    pred_act_bool = ((jax.nn.sigmoid(act_flat) > act_threshold).astype(jnp.int32)
                     * exp_mask.astype(jnp.int32)) == 1
    selected = pred_act_bool & (aaidx != -1)
    cls = jnp.arange(C)
    match = selected[:, :, None] & (aaidx[:, :, None] == cls[None, None, :])
    term = jnp.where(match, act_flat[:, :, None], 0.0)
    mapped = term.max(axis=1)
    exist = mapped != 0.0
    final = jnp.where(exist, mapped, non_exist)
    return {"final_outputs": final, "perobj_action": act_out, "perobj_object": obj_out}


if __name__ == "__main__":
    B, MAX_OBJS, D = 4, 8, 32
    NUM_OBJECT, NUM_ACTION, NUM_CLASSES = 8, 8, 16
    ACT_THRESHOLD = 0.5

    key = jax.random.PRNGKey(0)
    k_inp, k_mask, k_aa, k_params = jax.random.split(key, 4)

    inp = jax.random.normal(k_inp, (B, MAX_OBJS, D), jnp.float32)
    objmask = (jax.random.uniform(k_mask, (B, MAX_OBJS)) > 0.3).astype(jnp.float32)
    objmask = objmask.at[:, 0].set(1.0)   # guarantee >= 1 valid object per batch
    aaidx_tgts = jax.random.randint(
        k_aa, (B, MAX_OBJS * NUM_ACTION), -1, NUM_CLASSES, jnp.int32)

    params = make_params(k_params, D, NUM_OBJECT, NUM_ACTION, NUM_CLASSES)
    wb = prepare_params(params)                 # fused once, off the hot path
    num_cores = _detect_num_tensorcores()

    out = edm_task1_forward(inp, objmask, aaidx_tgts, wb,
                            num_object=NUM_OBJECT, num_action=NUM_ACTION,
                            num_classes=NUM_CLASSES,
                            act_threshold=ACT_THRESHOLD,
                            num_cores=num_cores)
    jax.block_until_ready(out)

    ref = edm_task1_reference(inp, objmask, aaidx_tgts, params,
                              act_threshold=ACT_THRESHOLD)
    for name in ("final_outputs", "perobj_action", "perobj_object"):
        np.testing.assert_allclose(np.asarray(out[name]), np.asarray(ref[name]),
                                   rtol=1e-5, atol=1e-5)

    print("KERNEL_OK")
</pallas_src>

<mosaic_0001>
module attributes {stable_mosaic.version = 11 : i64} {
  func.func @edm_task1_kernel(%arg0: i32, %arg1: memref<4x8x9xi32, #tpu.memory_space<vmem>>, %arg2: memref<4x8x32xf32, #tpu.memory_space<vmem>>, %arg3: memref<33x32xf32, #tpu.memory_space<vmem>>, %arg4: memref<4x9x16xf32, #tpu.memory_space<vmem>>) attributes {dimension_semantics = [#tpu.dimension_semantics<parallel>], iteration_bounds = array<i64: 1>, scalar_prefetch = 0 : i64, scratch_operands = 0 : i64, tpu.core_type = #tpu.core_type<tc>, window_params = [{transform_indices = @transform_0, window_bounds = array<i64: 4, 8, 9>}, {transform_indices = @transform_1, window_bounds = array<i64: 4, 8, 32>}, {pipeline_mode = #tpu.pipeline_mode<synchronous>, transform_indices = @transform_2, window_bounds = array<i64: 33, 32>}, {transform_indices = @transform_3, window_bounds = array<i64: 4, 9, 16>}]} {
    %c0 = arith.constant 0 : index
    %c0_0 = arith.constant 0 : index
    %c0_1 = arith.constant 0 : index
    %0 = vector.load %arg1[%c0, %c0_0, %c0_1] : memref<4x8x9xi32, #tpu.memory_space<vmem>>, vector<4x8x9xi32>
    %1 = vector.extract_strided_slice %0 {offsets = [0, 0, 0], sizes = [4, 8, 8], strides = [1, 1, 1]} : vector<4x8x9xi32> to vector<4x8x8xi32>
    %2 = vector.shape_cast %1 : vector<4x8x8xi32> to vector<32x8xi32>
    %3 = vector.extract_strided_slice %0 {offsets = [0, 0, 8], sizes = [4, 8, 1], strides = [1, 1, 1]} : vector<4x8x9xi32> to vector<4x8x1xi32>
    %4 = arith.sitofp %3 : vector<4x8x1xi32> to vector<4x8x1xf32>
    %c0_2 = arith.constant 0 : index
    %c0_3 = arith.constant 0 : index
    %c0_4 = arith.constant 0 : index
    %5 = vector.load %arg2[%c0_2, %c0_3, %c0_4] : memref<4x8x32xf32, #tpu.memory_space<vmem>>, vector<4x8x32xf32>
    %cst = arith.constant dense<0.000000e+00> : vector<4x1xf32>
    %6 = vector.multi_reduction <add>, %4, %cst [1] : vector<4x8x1xf32> to vector<4x1xf32>
    %7 = vector.broadcast %4 : vector<4x8x1xf32> to vector<4x8x32xf32>
    %8 = arith.mulf %5, %7 : vector<4x8x32xf32>
    %cst_5 = arith.constant dense<0.000000e+00> : vector<4x32xf32>
    %9 = vector.multi_reduction <add>, %8, %cst_5 [1] : vector<4x8x32xf32> to vector<4x32xf32>
    %10 = tpu.reciprocal %6 : vector<4x1xf32> -> vector<4x1xf32>
    %11 = vector.broadcast %10 : vector<4x1xf32> to vector<4x32xf32>
    %12 = arith.mulf %9, %11 : vector<4x32xf32>
    %13 = vector.shape_cast %5 : vector<4x8x32xf32> to vector<32x32xf32>
    %c0_6 = arith.constant 0 : index
    %c0_7 = arith.constant 0 : index
    %14 = vector.load %arg3[%c0_6, %c0_7] : memref<33x32xf32, #tpu.memory_space<vmem>>, vector<33x32xf32>
    %15 = vector.extract_strided_slice %14 {offsets = [0, 0], sizes = [32, 32], strides = [1, 1]} : vector<33x32xf32> to vector<32x32xf32>
    %16 = vector.extract_strided_slice %14 {offsets = [32, 0], sizes = [1, 32], strides = [1, 1]} : vector<33x32xf32> to vector<1x32xf32>
    %17 = vector.extract_strided_slice %15 {offsets = [0, 0], sizes = [32, 16], strides = [1, 1]} : vector<32x32xf32> to vector<32x16xf32>
    %cst_8 = arith.constant dense<0.000000e+00> : vector<32x16xf32>
    %18 = tpu.matmul %13, %17, %cst_8 {dimension_numbers = #tpu.dot_dimension_numbers<[1], [0], [0], [1], [0, 0, 1, 1], [], []>} : vector<32x32xf32>, vector<32x16xf32>, vector<32x16xf32> -> vector<32x16xf32>
    %19 = vector.extract_strided_slice %16 {offsets = [0, 0], sizes = [1, 16], strides = [1, 1]} : vector<1x32xf32> to vector<1x16xf32>
    %20 = vector.broadcast %19 : vector<1x16xf32> to vector<32x16xf32>
    %21 = arith.addf %18, %20 : vector<32x16xf32>
    %22 = vector.extract_strided_slice %15 {offsets = [0, 16], sizes = [32, 16], strides = [1, 1]} : vector<32x32xf32> to vector<32x16xf32>
    %cst_9 = arith.constant dense<0.000000e+00> : vector<4x16xf32>
    %23 = tpu.matmul %12, %22, %cst_9 {dimension_numbers = #tpu.dot_dimension_numbers<[1], [0], [0], [1], [0, 0, 1, 1], [], []>} : vector<4x32xf32>, vector<32x16xf32>, vector<4x16xf32> -> vector<4x16xf32>
    %24 = vector.extract_strided_slice %16 {offsets = [0, 16], sizes = [1, 16], strides = [1, 1]} : vector<1x32xf32> to vector<1x16xf32>
    %25 = vector.broadcast %24 : vector<1x16xf32> to vector<4x16xf32>
    %26 = arith.addf %23, %25 : vector<4x16xf32>
    %27 = vector.extract_strided_slice %21 {offsets = [0, 8], sizes = [32, 8], strides = [1, 1]} : vector<32x16xf32> to vector<32x8xf32>
    %cst_10 = arith.constant 0.000000e+00 : f32
    %28 = vector.broadcast %cst_10 : f32 to vector<32x8xf32>
    %29 = arith.cmpf ogt, %27, %28 : vector<32x8xf32>
    %c-1_i32 = arith.constant -1 : i32
    %30 = vector.broadcast %c-1_i32 : i32 to vector<32x8xi32>
    %31 = arith.cmpi ne, %2, %30 : vector<32x8xi32>
    %32 = arith.andi %29, %31 : vector<32x8xi1>
    %33 = tpu.iota {dimensions = array<i32: 1>} : vector<32x16xi32>
    %cst_11 = arith.constant 0xFF800000 : f32
    %34 = vector.broadcast %cst_11 : f32 to vector<32x16xf32>
    %35 = vector.extract_strided_slice %32 {offsets = [0, 0], sizes = [32, 1], strides = [1, 1]} : vector<32x8xi1> to vector<32x1xi1>
    %36 = vector.extract_strided_slice %2 {offsets = [0, 0], sizes = [32, 1], strides = [1, 1]} : vector<32x8xi32> to vector<32x1xi32>
    %37 = vector.broadcast %36 : vector<32x1xi32> to vector<32x16xi32>
    %38 = arith.cmpi eq, %37, %33 : vector<32x16xi32>
    %39 = vector.broadcast %35 : vector<32x1xi1> to vector<32x16xi1>
    %40 = arith.andi %39, %38 : vector<32x16xi1>
    %41 = vector.extract_strided_slice %27 {offsets = [0, 0], sizes = [32, 1], strides = [1, 1]} : vector<32x8xf32> to vector<32x1xf32>
    %cst_12 = arith.constant 0.000000e+00 : f32
    %42 = vector.shape_cast %41 : vector<32x1xf32> to vector<32x1xf32>
    %43 = vector.broadcast %42 : vector<32x1xf32> to vector<32x16xf32>
    %44 = vector.broadcast %cst_12 : f32 to vector<32x16xf32>
    %45 = arith.select %40, %43, %44 : vector<32x16xi1>, vector<32x16xf32>
    %46 = arith.maximumf %34, %45 : vector<32x16xf32>
    %47 = vector.extract_strided_slice %32 {offsets = [0, 1], sizes = [32, 1], strides = [1, 1]} : vector<32x8xi1> to vector<32x1xi1>
    %48 = vector.extract_strided_slice %2 {offsets = [0, 1], sizes = [32, 1], strides = [1, 1]} : vector<32x8xi32> to vector<32x1xi32>
    %49 = vector.broadcast %48 : vector<32x1xi32> to vector<32x16xi32>
    %50 = arith.cmpi eq, %49, %33 : vector<32x16xi32>
    %51 = vector.broadcast %47 : vector<32x1xi1> to vector<32x16xi1>
    %52 = arith.andi %51, %50 : vector<32x16xi1>
    %53 = vector.extract_strided_slice %27 {offsets = [0, 1], sizes = [32, 1], strides = [1, 1]} : vector<32x8xf32> to vector<32x1xf32>
    %cst_13 = arith.constant 0.000000e+00 : f32
    %54 = vector.shape_cast %53 : vector<32x1xf32> to vector<32x1xf32>
    %55 = vector.broadcast %54 : vector<32x1xf32> to vector<32x16xf32>
    %56 = vector.broadcast %cst_13 : f32 to vector<32x16xf32>
    %57 = arith.select %52, %55, %56 : vector<32x16xi1>, vector<32x16xf32>
    %58 = arith.maximumf %46, %57 : vector<32x16xf32>
    %59 = vector.extract_strided_slice %32 {offsets = [0, 2], sizes = [32, 1], strides = [1, 1]} : vector<32x8xi1> to vector<32x1xi1>
    %60 = vector.extract_strided_slice %2 {offsets = [0, 2], sizes = [32, 1], strides = [1, 1]} : vector<32x8xi32> to vector<32x1xi32>
    %61 = vector.broadcast %60 : vector<32x1xi32> to vector<32x16xi32>
    %62 = arith.cmpi eq, %61, %33 : vector<32x16xi32>
    %63 = vector.broadcast %59 : vector<32x1xi1> to vector<32x16xi1>
    %64 = arith.andi %63, %62 : vector<32x16xi1>
    %65 = vector.extract_strided_slice %27 {offsets = [0, 2], sizes = [32, 1], strides = [1, 1]} : vector<32x8xf32> to vector<32x1xf32>
    %cst_14 = arith.constant 0.000000e+00 : f32
    %66 = vector.shape_cast %65 : vector<32x1xf32> to vector<32x1xf32>
    %67 = vector.broadcast %66 : vector<32x1xf32> to vector<32x16xf32>
    %68 = vector.broadcast %cst_14 : f32 to vector<32x16xf32>
    %69 = arith.select %64, %67, %68 : vector<32x16xi1>, vector<32x16xf32>
    %70 = arith.maximumf %58, %69 : vector<32x16xf32>
    %71 = vector.extract_strided_slice %32 {offsets = [0, 3], sizes = [32, 1], strides = [1, 1]} : vector<32x8xi1> to vector<32x1xi1>
    %72 = vector.extract_strided_slice %2 {offsets = [0, 3], sizes = [32, 1], strides = [1, 1]} : vector<32x8xi32> to vector<32x1xi32>
    %73 = vector.broadcast %72 : vector<32x1xi32> to vector<32x16xi32>
    %74 = arith.cmpi eq, %73, %33 : vector<32x16xi32>
    %75 = vector.broadcast %71 : vector<32x1xi1> to vector<32x16xi1>
    %76 = arith.andi %75, %74 : vector<32x16xi1>
    %77 = vector.extract_strided_slice %27 {offsets = [0, 3], sizes = [32, 1], strides = [1, 1]} : vector<32x8xf32> to vector<32x1xf32>
    %cst_15 = arith.constant 0.000000e+00 : f32
    %78 = vector.shape_cast %77 : vector<32x1xf32> to vector<32x1xf32>
    %79 = vector.broadcast %78 : vector<32x1xf32> to vector<32x16xf32>
    %80 = vector.broadcast %cst_15 : f32 to vector<32x16xf32>
    %81 = arith.select %76, %79, %80 : vector<32x16xi1>, vector<32x16xf32>
    %82 = arith.maximumf %70, %81 : vector<32x16xf32>
    %83 = vector.extract_strided_slice %32 {offsets = [0, 4], sizes = [32, 1], strides = [1, 1]} : vector<32x8xi1> to vector<32x1xi1>
    %84 = vector.extract_strided_slice %2 {offsets = [0, 4], sizes = [32, 1], strides = [1, 1]} : vector<32x8xi32> to vector<32x1xi32>
    %85 = vector.broadcast %84 : vector<32x1xi32> to vector<32x16xi32>
    %86 = arith.cmpi eq, %85, %33 : vector<32x16xi32>
    %87 = vector.broadcast %83 : vector<32x1xi1> to vector<32x16xi1>
    %88 = arith.andi %87, %86 : vector<32x16xi1>
    %89 = vector.extract_strided_slice %27 {offsets = [0, 4], sizes = [32, 1], strides = [1, 1]} : vector<32x8xf32> to vector<32x1xf32>
    %cst_16 = arith.constant 0.000000e+00 : f32
    %90 = vector.shape_cast %89 : vector<32x1xf32> to vector<32x1xf32>
    %91 = vector.broadcast %90 : vector<32x1xf32> to vector<32x16xf32>
    %92 = vector.broadcast %cst_16 : f32 to vector<32x16xf32>
    %93 = arith.select %88, %91, %92 : vector<32x16xi1>, vector<32x16xf32>
    %94 = arith.maximumf %82, %93 : vector<32x16xf32>
    %95 = vector.extract_strided_slice %32 {offsets = [0, 5], sizes = [32, 1], strides = [1, 1]} : vector<32x8xi1> to vector<32x1xi1>
    %96 = vector.extract_strided_slice %2 {offsets = [0, 5], sizes = [32, 1], strides = [1, 1]} : vector<32x8xi32> to vector<32x1xi32>
    %97 = vector.broadcast %96 : vector<32x1xi32> to vector<32x16xi32>
    %98 = arith.cmpi eq, %97, %33 : vector<32x16xi32>
    %99 = vector.broadcast %95 : vector<32x1xi1> to vector<32x16xi1>
    %100 = arith.andi %99, %98 : vector<32x16xi1>
    %101 = vector.extract_strided_slice %27 {offsets = [0, 5], sizes = [32, 1], strides = [1, 1]} : vector<32x8xf32> to vector<32x1xf32>
    %cst_17 = arith.constant 0.000000e+00 : f32
    %102 = vector.shape_cast %101 : vector<32x1xf32> to vector<32x1xf32>
    %103 = vector.broadcast %102 : vector<32x1xf32> to vector<32x16xf32>
    %104 = vector.broadcast %cst_17 : f32 to vector<32x16xf32>
    %105 = arith.select %100, %103, %104 : vector<32x16xi1>, vector<32x16xf32>
    %106 = arith.maximumf %94, %105 : vector<32x16xf32>
    %107 = vector.extract_strided_slice %32 {offsets = [0, 6], sizes = [32, 1], strides = [1, 1]} : vector<32x8xi1> to vector<32x1xi1>
    %108 = vector.extract_strided_slice %2 {offsets = [0, 6], sizes = [32, 1], strides = [1, 1]} : vector<32x8xi32> to vector<32x1xi32>
    %109 = vector.broadcast %108 : vector<32x1xi32> to vector<32x16xi32>
    %110 = arith.cmpi eq, %109, %33 : vector<32x16xi32>
    %111 = vector.broadcast %107 : vector<32x1xi1> to vector<32x16xi1>
    %112 = arith.andi %111, %110 : vector<32x16xi1>
    %113 = vector.extract_strided_slice %27 {offsets = [0, 6], sizes = [32, 1], strides = [1, 1]} : vector<32x8xf32> to vector<32x1xf32>
    %cst_18 = arith.constant 0.000000e+00 : f32
    %114 = vector.shape_cast %113 : vector<32x1xf32> to vector<32x1xf32>
    %115 = vector.broadcast %114 : vector<32x1xf32> to vector<32x16xf32>
    %116 = vector.broadcast %cst_18 : f32 to vector<32x16xf32>
    %117 = arith.select %112, %115, %116 : vector<32x16xi1>, vector<32x16xf32>
    %118 = arith.maximumf %106, %117 : vector<32x16xf32>
    %119 = vector.extract_strided_slice %32 {offsets = [0, 7], sizes = [32, 1], strides = [1, 1]} : vector<32x8xi1> to vector<32x1xi1>
    %120 = vector.extract_strided_slice %2 {offsets = [0, 7], sizes = [32, 1], strides = [1, 1]} : vector<32x8xi32> to vector<32x1xi32>
    %121 = vector.broadcast %120 : vector<32x1xi32> to vector<32x16xi32>
    %122 = arith.cmpi eq, %121, %33 : vector<32x16xi32>
    %123 = vector.broadcast %119 : vector<32x1xi1> to vector<32x16xi1>
    %124 = arith.andi %123, %122 : vector<32x16xi1>
    %125 = vector.extract_strided_slice %27 {offsets = [0, 7], sizes = [32, 1], strides = [1, 1]} : vector<32x8xf32> to vector<32x1xf32>
    %cst_19 = arith.constant 0.000000e+00 : f32
    %126 = vector.shape_cast %125 : vector<32x1xf32> to vector<32x1xf32>
    %127 = vector.broadcast %126 : vector<32x1xf32> to vector<32x16xf32>
    %128 = vector.broadcast %cst_19 : f32 to vector<32x16xf32>
    %129 = arith.select %124, %127, %128 : vector<32x16xi1>, vector<32x16xf32>
    %130 = arith.maximumf %118, %129 : vector<32x16xf32>
    %131 = vector.shape_cast %130 : vector<32x16xf32> to vector<4x8x16xf32>
    %cst_20 = arith.constant dense<0xFF800000> : vector<4x16xf32>
    %132 = vector.multi_reduction <maximumf>, %131, %cst_20 [1] : vector<4x8x16xf32> to vector<4x16xf32>
    %cst_21 = arith.constant 0.000000e+00 : f32
    %133 = vector.broadcast %cst_21 : f32 to vector<4x16xf32>
    %134 = arith.cmpf one, %132, %133 : vector<4x16xf32>
    %135 = arith.select %134, %132, %26 : vector<4x16xi1>, vector<4x16xf32>
    %136 = vector.shape_cast %21 : vector<32x16xf32> to vector<4x8x16xf32>
    %c0_22 = arith.constant 0 : index
    %c0_23 = arith.constant 0 : index
    %c0_24 = arith.constant 0 : index
    %137 = vector.load %arg4[%c0_22, %c0_23, %c0_24] : memref<4x9x16xf32, #tpu.memory_space<vmem>>, vector<4x8x16xf32>
    tpu.vector_store %arg4[%c0_22, %c0_23, %c0_24], %136 {strides = array<i32>} : memref<4x9x16xf32, #tpu.memory_space<vmem>>, vector<4x8x16xf32>,
    %138 = vector.shape_cast %135 : vector<4x16xf32> to vector<4x1x16xf32>
    %c0_25 = arith.constant 0 : index
    %c8 = arith.constant 8 : index
    %c0_26 = arith.constant 0 : index
    %139 = vector.load %arg4[%c0_25, %c8, %c0_26] : memref<4x9x16xf32, #tpu.memory_space<vmem>>, vector<4x1x16xf32>
    tpu.vector_store %arg4[%c0_25, %c8, %c0_26], %138 {strides = array<i32>} : memref<4x9x16xf32, #tpu.memory_space<vmem>>, vector<4x1x16xf32>,
    return
  }
  func.func @transform_0(%arg0: i32) -> (i32, i32, i32) {
    %c0_i32 = arith.constant 0 : i32
    %c0_i32_0 = arith.constant 0 : i32
    %c0_i32_1 = arith.constant 0 : i32
    return %arg0, %c0_i32, %c0_i32_0 : i32, i32, i32
  }
  func.func @transform_1(%arg0: i32) -> (i32, i32, i32) {
    %c0_i32 = arith.constant 0 : i32
    %c0_i32_0 = arith.constant 0 : i32
    %c0_i32_1 = arith.constant 0 : i32
    return %arg0, %c0_i32, %c0_i32_0 : i32, i32, i32
  }
  func.func @transform_2(%arg0: i32) -> (i32, i32) {
    %c0_i32 = arith.constant 0 : i32
    %c0_i32_0 = arith.constant 0 : i32
    %c0_i32_1 = arith.constant 0 : i32
    return %c0_i32, %c0_i32_0 : i32, i32
  }
  func.func @transform_3(%arg0: i32) -> (i32, i32, i32) {
    %c0_i32 = arith.constant 0 : i32
    %c0_i32_0 = arith.constant 0 : i32
    %c0_i32_1 = arith.constant 0 : i32
    return %arg0, %c0_i32, %c0_i32_0 : i32, i32, i32
  }
}

</mosaic_0001>

<bundles_post_ra>
// kernel: edm_task1_forward.1
= control target key start
LH: loop header
LB: loop body
LE: loop exit
PB: predicated region body
PF: predicated region fallthrough
CT: control target
= control target key end

     0   :  { %vm79_vm0 = vcmask 261120   ;;  %v1083_v2 = vmov 0   ;;  %vm26_vm1 = vcmask 72768   ;;  %s1084_s24 = smov 112   ;;  %v1085_v14 = vmov 8   ;;  %s1086_s7 = smov 8   ;;  %s1646_s2 = inlined_call_operand.vmem [shape: f32[33,32], index: 2, kind: input, shape index: {}]   ;;  %s1647_s1 = inlined_call_operand.vmem [shape: f32[4,8,32], index: 1, kind: input, shape index: {}]   ;;  %s1648_s0 = inlined_call_operand.vmem [shape: s32[4,8,9], index: 0, kind: input, shape index: {}]   ;;  %s1649_s3 = inlined_call_operand.vmem [shape: f32[4,9,16], index: 3, kind: output, shape index: {}]  }
   0x1   :  { %v136_v0 = vld [vmem:[%s1646_s2] sm:$0xff]  ;;  %v137_v1 = vld [vmem:[%s1646_s2 + $0x8] sm:$0xff]  ;;  %1007 = vset.pattern.permute.xlu0 %v1083_v2  ;;  %v138_v5 = vld [vmem:[%s1646_s2 + $0x10] sm:$0xff]  ;;  %1000 = vset.pattern.permute.xlu1 %v1085_v14  ;;  %v1087_v40 = vmov 1   ;;  %v1088_v44 = vmov 2   ;;  %v1089_v48 = vmov 3  }
   0x2   :  { %v995_v3 = vpack.i.bf16 %v137_v1, %v136_v0  ;;  %v960_v4 = vpack.c.bf16 %v137_v1, %v136_v0  ;;  %v139_v6 = vld [vmem:[%s1646_s2 + $0x18] sm:$0xff]  ;;  %v1140_v7 = vld [vmem:[%s1647_s1] sm:$0xff]  ;;  %v1147_v9 = vld [vmem:[%s1648_s0 + $0x8] sm:$0xff]  ;;  %v1090_v51 = vmov 4   ;;  %v1091_v56 = vmov 5  }
   0x3   :  { %v964_v8 = vpack.c.bf16 %v139_v6, %v138_v5  ;;  %943 = vmatprep.mubr.msk.f32.mxu0 %vm79_vm0, %v1140_v7  ;;  %v1153_v10 = vld [vmem:[%s1648_s0 + $0x18] sm:$0xff]  ;;  %v1158_v11 = vld [vmem:[%s1648_s0 + $0x10] sm:$0xff]  ;;  %v19_v12 = vcvt.s32.f32 %v1147_v9  ;;  %v1164_v13 = vld [vmem:[%s1646_s2 + $0x20] ss:$0 sm:$0xff]  ;;  %vm349_vm2 = vcmp.ne.s32.totalorder %v1147_v9, 4294967295  ;;  %v1001_v26 = vpack.i.bf16 %v139_v6, %v138_v5 }
   0x4   :  { %996 = vrot.lane.b32.xlu0 %v995_v3, %s1084_s24  ;;  %961 = vmatprep.subr.bf16.mxu0 %v960_v4  ;;  %v20_v15 = vcvt.s32.f32 %v1158_v11  ;;  %v21_v16 = vcvt.s32.f32 %v1153_v10  ;;  %v1179_v21 = vld [vmem:[%s1647_s1 + $0x8] sm:$0xff]  ;;  %v353_v22 = vsel %vm349_vm2, 1, %v1083_v2  ;;  %v1185_v24 = vld [vmem:[%s1647_s1 + $0x10] sm:$0xff]  ;;  %vm351_vm3 = vcmp.ne.s32.totalorder %v1153_v10, 4294967295  ;;  %v1193_v29 = vld [vmem:[%s1648_s0] sm:$0xff] }
   0x5   :  { %963 = vmatpush3.bf16.msra.mxu0 %v960_v4  ;;  %v34_v17 = vsel %vm26_vm1, %v19_v12, 0.0  ;;  %v1200_v30 = vld [vmem:[%s1647_s1 + $0x18] sm:$0xff]  ;;  %v355_v31 = vsel %vm351_vm3, 1, %v1083_v2  ;;  %vm348_vm4 = vcmp.ne.s32.totalorder %v1193_v29, 4294967295  ;;  %vm350_vm5 = vcmp.ne.s32.totalorder %v1158_v11, 4294967295 }
   0x6   :  { %965 = vmatprep.subr.bf16.mxu0 %v964_v8  ;;  %67 = vperm.xlu1 %1000, %v20_v15   ;;  %v48_v18 = vsel %vm26_vm1, %v21_v16, 0.0  ;;  %v35_v19 = vrot.slane %v34_v17, 4  ;;  %v352_v36 = vsel %vm348_vm4, 1, %v1083_v2  ;;  %v354_v39 = vsel %vm350_vm5, 1, %v1083_v2 }
   0x7   :  { %v49_v20 = vrot.slane %v48_v18, 4  ;;  %v18_v41 = vcvt.s32.f32 %v1193_v29  ;;  %v41_v46 = vsel %vm26_vm1, %v20_v15, 0.0  ;;  %v1092_v59 = vmov 6  }
   0x8   :  { %269 = vrot.lane.b32.xlu0 %v1164_v13, %s1084_s24  ;;  %v36_v23 = vadd.f32 %v35_v19, %v34_v17  ;;  %v42_v49 = vrot.slane %v41_v46, 4  ;;  %v1093_v62 = vmov 7   ;;  %v1094_v3 = vmov 0.0|0.0  }
   0x9   :  { %967 = vmatpush3.bf16.msra.mxu0 %v964_v8  ;;  %v50_v25 = vadd.f32 %v49_v20, %v48_v18  ;;  %v27_v42 = vsel %vm26_vm1, %v18_v41, 0.0  ;;  %968 = vmatprep.subr.bf16.mxu1 %v1094_v3  ;;  %vm1095_vm6 = vmmov 0   ;;  %v1096_v4 = vmov 0.0  }
   0xa   :  { %72 = vperm.xlu1 %1000, %v21_v16   ;;  %v37_v27 = vrot.slane %v36_v23, 2  ;;  %v28_v45 = vrot.slane %v27_v42, 4  ;;  %v43_v52 = vadd.f32 %v42_v49, %v41_v46  ;;  %957 = vmatprep.mubr.msk.f32.mxu1 %vm1095_vm6, %v1096_v4  ;;  %vm246_vm7 = vcmask 1041409  }
   0xb   :  { %v51_v28 = vrot.slane %v50_v25, 2  ;;  %vm248_vm8 = vcmask 1042434   ;;  %vm250_vm9 = vcmask 1043459   ;;  %vm858_vm10 = vcmask 130048  }
   0xc   :  { %944 = vmatmul.mubr.msk.f32.vlgmr.msra.gmra.mrb[0].mxu0 %vm79_vm0, %v1179_v21  ;;  %358 = vrot.lane.b32.xlu0 %v353_v22, %s1086_s7  ;;  %v38_v32 = vadd.f32 %v37_v27, %v36_v23  ;;  %v29_v50 = vadd.f32 %v28_v45, %v27_v42  ;;  %v44_v54 = vrot.slane %v43_v52, 2 }
   0xd   :  { %946 = vmatprep.mubr.msk.f32.mxu0 %vm79_vm0, %v1185_v24  ;;  %v52_v33 = vadd.f32 %v51_v28, %v50_v25 }
   0xe   :  { %1002 = vrot.lane.b32.xlu1 %v1001_v26, %s1084_s24  ;;  %v39_v34 = vrot.slane %v38_v32, 1  ;;  %v30_v53 = vrot.slane %v29_v50, 2  ;;  %v45_v57 = vadd.f32 %v44_v54, %v43_v52 }
   0xf   :  { %v53_v35 = vrot.slane %v52_v33, 1  ;;  %1006 = vset.pattern.permute.xlu1 %v1083_v2 }
  0x10   :  { %947 = vmatmul.mubr.msk.f32.gmra.mrb[2].mxu0 %vm79_vm0, %v1200_v30  ;;  %362 = vrot.lane.b32.xlu0 %v355_v31, %s1086_s7  ;;  %v40_v37 = vadd.f32 %v39_v34, %v38_v32  ;;  %v31_v55 = vadd.f32 %v30_v53, %v29_v50  ;;  %v46_v60 = vrot.slane %v45_v57, 1 }
  0x11   :  { %v54_v38 = vadd.f32 %v53_v35, %v52_v33 }
  0x12   :  { %356 = vrot.lane.b32.xlu1 %v352_v36, %s1086_s7  ;;  %1075 = vrcp.f32 %v40_v37  ;;  %v32_v58 = vrot.slane %v31_v55, 1  ;;  %v47_v63 = vadd.f32 %v46_v60, %v45_v57 }
  0x13   :  { %1077 = vrcp.f32 %v54_v38 }
  0x14   :  { %378 = vperm.xlu0 %1007, %v1147_v9   ;;  %v33_v61 = vadd.f32 %v32_v58, %v31_v55 }
  0x16   :  { %360 = vrot.lane.b32.xlu1 %v354_v39, %s1086_s7  ;;  %1079 = vrcp.f32 %v33_v61 }
  0x17   :  { %1081 = vrcp.f32 %v47_v63 }
  0x18   :  { %1011 = vset.pattern.permute.xlu0 %v1087_v40 }
  0x19   :  { %442 = vperm.xlu0 %1011, %v1147_v9  }
  0x1a   :  { %375 = vperm.xlu1 %1006, %v1193_v29  }
  0x1c   :  { %v1076_v43 = vpop.eup %1075 }
  0x1d   :  { %1013 = vset.pattern.permute.xlu0 %v1088_v44  ;;  %v1078_v47 = vpop.eup %1077 }
  0x1e   :  { %502 = vperm.xlu0 %1013, %v1147_v9   ;;  %1008 = vset.pattern.permute.xlu1 %v1085_v14 }
  0x1f   :  { %119 = vperm.xlu1 %1008, %v1076_v43  }
  0x20   :  { %v1080_v0 = vpop.eup %1079 }
  0x21   :  { %v1082_v1 = vpop.eup %1081 }
  0x22   :  { %1015 = vset.pattern.permute.xlu0 %v1089_v48 }
  0x23   :  { %562 = vperm.xlu0 %1015, %v1147_v9   ;;  %129 = vperm.xlu1 %1008, %v1078_v47  }
  0x27   :  { %1017 = vset.pattern.permute.xlu0 %v1090_v51  ;;  %1009 = vset.pattern.permute.xlu1 %v1083_v2 }
  0x28   :  { %622 = vperm.xlu0 %1017, %v1147_v9   ;;  %381 = vperm.xlu1 %1009, %v1158_v11  }
  0x2c   :  { %1019 = vset.pattern.permute.xlu0 %v1091_v56  ;;  %384 = vperm.xlu1 %1009, %v1153_v10  }
  0x2d   :  { %682 = vperm.xlu0 %1019, %v1147_v9  }
  0x30   :  { %1010 = vset.pattern.permute.xlu1 %v1087_v40 }
  0x31   :  { %1021 = vset.pattern.permute.xlu0 %v1092_v59  ;;  %439 = vperm.xlu1 %1010, %v1193_v29  }
  0x32   :  { %742 = vperm.xlu0 %1021, %v1147_v9  }
  0x35   :  { %445 = vperm.xlu1 %1010, %v1158_v11  }
  0x36   :  { %1023 = vset.pattern.permute.xlu0 %v1093_v62 }
  0x37   :  { %802 = vperm.xlu0 %1023, %v1147_v9  }
  0x39   :  { %448 = vperm.xlu1 %1010, %v1153_v10  }
  0x3b   :  { %1024 = vset.pattern.permute.xlu0 %v1085_v14 }
  0x3c   :  { %57 = vperm.xlu0 %1024, %v18_v41  }
  0x3d   :  { %1012 = vset.pattern.permute.xlu1 %v1088_v44 }
  0x3e   :  { %499 = vperm.xlu1 %1012, %v1193_v29  }
  0x40   :  { %62 = vperm.xlu0 %1024, %v19_v12  }
  0x42   :  { %505 = vperm.xlu1 %1012, %v1158_v11  }
  0x44   :  { %114 = vperm.xlu0 %1024, %v1080_v0  }
  0x46   :  { %508 = vperm.xlu1 %1012, %v1153_v10  }
  0x48   :  { %124 = vperm.xlu0 %1024, %v1082_v1  }
  0x4a   :  { %1014 = vset.pattern.permute.xlu1 %v1089_v48 }
  0x4b   :  { %559 = vperm.xlu1 %1014, %v1193_v29  }
  0x4f   :  { %565 = vperm.xlu1 %1014, %v1158_v11  }
  0x53   :  { %568 = vperm.xlu1 %1014, %v1153_v10  }
  0x57   :  { %1016 = vset.pattern.permute.xlu1 %v1090_v51 }
  0x58   :  { %619 = vperm.xlu1 %1016, %v1193_v29  }
  0x5c   :  { %625 = vperm.xlu1 %1016, %v1158_v11  }
  0x60   :  { %628 = vperm.xlu1 %1016, %v1153_v10  }
  0x64   :  { %1018 = vset.pattern.permute.xlu1 %v1091_v56 }
  0x65   :  { %679 = vperm.xlu1 %1018, %v1193_v29  }
  0x69   :  { %685 = vperm.xlu1 %1018, %v1158_v11  }
  0x6d   :  { %688 = vperm.xlu1 %1018, %v1153_v10  }
  0x71   :  { %1020 = vset.pattern.permute.xlu1 %v1092_v59 }
  0x72   :  { %739 = vperm.xlu1 %1020, %v1193_v29  }
  0x76   :  { %v997_v5 = vpop.permute.xlu0 %996  ;;  %745 = vperm.xlu1 %1020, %v1158_v11  }
  0x77   :  { %v999_v6 = vunpack.i.h.bf16 %v997_v5  ;;  %v998_v8 = vunpack.i.l.bf16 %v997_v5 }
  0x79   :  { %v969_v9 = vpack.c.bf16 %v999_v6, %v998_v8 }
  0x7a   :  { %748 = vperm.xlu1 %1020, %v1153_v10   ;;  %v1249_v12 = vpop.permute.xlu0 %269 }
  0x7b   :  { %970 = vmatpush3.bf16.msra.mxu1 %v969_v9 }
  0x7c   :  { %971 = vmatprep.subr.bf16.mxu1 %v1094_v3 }
  0x7e   :  { %1022 = vset.pattern.permute.xlu1 %v1093_v62  ;;  %v1252_v16 = vpop.permute.xlu0 %358 }
  0x7f   :  { %799 = vperm.xlu1 %1022, %v1193_v29   ;;  %vm365_vm14 = vcmp.ne.s32.totalorder %v1252_v16, 0 }
  0x82   :  { %v1256_v18 = vpop.permute.xlu0 %362 }
  0x83   :  { %805 = vperm.xlu1 %1022, %v1158_v11   ;;  %vm367_vm2 = vcmp.ne.s32.totalorder %v1256_v18, 0 }
  0x85   :  { %v68_v15 = vpop.permute.xlu1 %67 }
  0x86   :  { %v77_v29 = vmul.f32 %v68_v15, %v1185_v24 }
  0x87   :  { %808 = vperm.xlu1 %1022, %v1153_v10  }
  0x88   :  { %v94_v33 = vsel %vm79_vm0, %v77_v29, 0.0 }
  0x89   :  { %v73_v17 = vpop.permute.xlu1 %72  ;;  %v95_v36 = vrot.slane %v94_v33, 4 }
  0x8a   :  { %v78_v31 = vmul.f32 %v73_v17, %v1200_v30 }
  0x8b   :  { %1031 = vset.pattern.permute.xlu1 %v1085_v14  ;;  %v96_v39 = vadd.f32 %v95_v36, %v94_v33 }
  0x8c   :  { %v101_v34 = vsel %vm79_vm0, %v78_v31, 0.0 }
  0x8d   :  { %v1003_v19 = vpop.permute.xlu1 %1002  ;;  %v102_v38 = vrot.slane %v101_v34, 4  ;;  %v97_v43 = vrot.slane %v96_v39, 2 }
  0x8e   :  { %v1005_v20 = vunpack.i.h.bf16 %v1003_v19  ;;  %v1004_v22 = vunpack.i.l.bf16 %v1003_v19 }
  0x8f   :  { %v103_v41 = vadd.f32 %v102_v38, %v101_v34  ;;  %v98_v51 = vadd.f32 %v97_v43, %v96_v39  ;;  %v1099_v43 = vmov 11  }
  0x90   :  { %v972_v23 = vpack.c.bf16 %v1005_v20, %v1004_v22 }
  0x91   :  { %v1276_v35 = vpop.permute.xlu1 %356  ;;  %v104_v44 = vrot.slane %v103_v41, 2  ;;  %v99_v58 = vrot.slane %v98_v51, 1 }
  0x92   :  { %973 = vmatpush3.bf16.msra.mxu1 %v972_v23  ;;  %vm364_vm13 = vcmp.ne.s32.totalorder %v1276_v35, 0 }
  0x93   :  { %v1258_v25 = vpop.permute.xlu0 %378  ;;  %v105_v54 = vadd.f32 %v104_v44, %v103_v41 }
  0x95   :  { %v1280_v40 = vpop.permute.xlu1 %360  ;;  %v106_v61 = vrot.slane %v105_v54, 1 }
  0x96   :  { %vm366_vm5 = vcmp.ne.s32.totalorder %v1280_v40, 0 }
  0x97   :  { %v107_v3 = vadd.f32 %v106_v61, %v105_v54 }
  0x98   :  { %v1260_v26 = vpop.permute.xlu0 %442 }
  0x99   :  { %v1285_v48 = vpop.permute.xlu1 %375 }
  0x9d   :  { %v1262_v11 = vpop.permute.xlu0 %502 }
  0x9e   :  { %v120_v57 = vpop.permute.xlu1 %119 }
  0xa2   :  { %v1264_v27 = vpop.permute.xlu0 %562  ;;  %v130_v4 = vpop.permute.xlu1 %129 }
  0xa3   :  { %v135_v15 = vmul.f32 %v130_v4, %v107_v3 }
  0xa7   :  { %v1266_v28 = vpop.permute.xlu0 %622  ;;  %v1289_v22 = vpop.permute.xlu1 %381 }
  0xab   :  { %v1294_v33 = vpop.permute.xlu1 %384 }
  0xac   :  { %v1268_v10 = vpop.permute.xlu0 %682 }
  0xb1   :  { %v1272_v32 = vpop.permute.xlu0 %742 }
  0xb6   :  { %v1278_v37 = vpop.permute.xlu0 %802 }
  0xbb   :  { %v58_v42 = vpop.permute.xlu0 %57 }
  0xbc   :  { %v75_v24 = vmul.f32 %v58_v42, %v1140_v7  ;;  %v1097_v42 = vmov 9  }
  0xbe   :  { %v80_v30 = vsel %vm79_vm0, %v75_v24, 0.0  ;;  %v1318_v24 = vpop.permute.xlu1 %439 }
  0xbf   :  { %v81_v45 = vrot.slane %v80_v30, 4  ;;  %v63_v46 = vpop.permute.xlu0 %62 }
  0xc0   :  { %v76_v47 = vmul.f32 %v63_v46, %v1179_v21  ;;  %v100_v21 = vadd.f32 %v99_v58, %v98_v51 }
  0xc1   :  { %v82_v49 = vadd.f32 %v81_v45, %v80_v30  ;;  %v1100_v45 = vmov 12  }
  0xc2   :  { %v87_v50 = vsel %vm79_vm0, %v76_v47, 0.0  ;;  %v1336_v30 = vpop.permute.xlu1 %445  ;;  %v1101_v47 = vmov 13  }
  0xc3   :  { %v83_v52 = vrot.slane %v82_v49, 2  ;;  %v88_v53 = vrot.slane %v87_v50, 4  ;;  %v115_v7 = vpop.permute.xlu0 %114 }
  0xc5   :  { %v89_v55 = vadd.f32 %v88_v53, %v87_v50  ;;  %v84_v56 = vadd.f32 %v83_v52, %v82_v49  ;;  %v1102_v50 = vmov 14  }
  0xc6   :  { %v1343_v44 = vpop.permute.xlu1 %448 }
  0xc7   :  { %v90_v59 = vrot.slane %v89_v55, 2  ;;  %v85_v60 = vrot.slane %v84_v56, 1  ;;  %v125_v1 = vpop.permute.xlu0 %124 }
  0xc8   :  { %v134_v8 = vmul.f32 %v125_v1, %v100_v21  ;;  %v1103_v1 = vmov 15  }
  0xc9   :  { %v91_v62 = vadd.f32 %v90_v59, %v89_v55  ;;  %v86_v63 = vadd.f32 %v85_v60, %v84_v56 }
  0xca   :  { %v1349_v46 = vpop.permute.xlu1 %499 }
  0xcb   :  { %v92_v0 = vrot.slane %v91_v62, 1  ;;  %v132_v5 = vmul.f32 %v115_v7, %v86_v63 }
  0xcd   :  { %v93_v6 = vadd.f32 %v92_v0, %v91_v62 }
  0xce   :  { %v1356_v49 = vpop.permute.xlu1 %505 }
  0xcf   :  { %v133_v9 = vmul.f32 %v120_v57, %v93_v6 }
  0xd1   :  { %v247_v17 = vsel %vm246_vm7, %v133_v9, %v132_v5 }
  0xd2   :  { %v249_v19 = vsel %vm248_vm8, %v134_v8, %v247_v17  ;;  %v1369_v52 = vpop.permute.xlu1 %508 }
  0xd3   :  { %v251_v20 = vsel %vm250_vm9, %v135_v15, %v249_v19 }
  0xd4   :  { %958 = vmatmul.mubr.msk.f32.vlgmr.msra.gmra.mrb[0].mxu1 %vm79_vm0, %v251_v20 }
  0xd6   :  { %v1379_v16 = vpop.permute.xlu1 %559 }
  0xda   :  { %v1386_v53 = vpop.permute.xlu1 %565 }
  0xde   :  { %v1392_v54 = vpop.permute.xlu1 %568 }
  0xdf   :  { %v945_v23 = vpop.f32.mrb[0].mxu0 }
  0xe0   :  { %v1292_v29 = vadd.f32 %v945_v23, %v1164_v13  ;;  %v223_v31 = vpop.f32.mrb[1].mxu0  ;;  %v372_v23 = vlaneseq }
  0xe1   :  { %v1297_v34 = vadd.f32 %v1164_v13, %v223_v31 }
  0xe2   :  { %421 = vperm.xlu0 %1024, %v1292_v29   ;;  %904 = vst.msk [vmem:[%s1649_s3 + $0x10] sm:$0xff] %vm858_vm10, %v1292_v29  ;;  %vm345_vm12 = vcmp.gt.f32.partialorder %v1292_v29, 0.0  ;;  %v1398_v55 = vpop.permute.xlu1 %619 }
  0xe3   :  { %v948_v36 = vpop.f32.mrb[2].mxu0  ;;  %416 = vperm.xlu1 %1031, %v1297_v34   ;;  %903 = vst.msk [vmem:[%s1649_s3] sm:$0xff] %vm858_vm10, %v1297_v34  ;;  %vm344_vm11 = vcmp.gt.f32.partialorder %v1297_v34, 0.0  ;;  %vm369_vm0 = vmand %vm345_vm12, %vm365_vm14 }
  0xe4   :  { %v1312_v38 = vadd.f32 %v948_v36, %v1164_v13  ;;  %v233_v39 = vpop.f32.mrb[3].mxu0  ;;  %vm368_vm15 = vmand %vm344_vm11, %vm364_vm13  ;;  %v1374_v35 = vsel %vm369_vm0, 1, %v1083_v2  ;;  %v1490_v36 = vand.u32 127, %v372_v23 }
  0xe5   :  { %v1315_v41 = vadd.f32 %v1164_v13, %v233_v39  ;;  %v1098_v13 = vmov 10   ;;  %v1367_v51 = vsel %vm368_vm15, 1, %v1083_v2 }
  0xe6   :  { %1025 = vset.pattern.permute.xlu0 %v1097_v42  ;;  %906 = vst.msk [vmem:[%s1649_s3 + $0x30] sm:$0xff] %vm858_vm10, %v1312_v38  ;;  %v1404_v56 = vpop.permute.xlu1 %625  ;;  %vm347_vm1 = vcmp.gt.f32.partialorder %v1312_v38, 0.0  ;;  %vm386_vm7 = vcmp.eq.s32.totalorder %v1285_v48, %v1490_v36  ;;  %vm387_vm9 = vcmp.eq.s32.totalorder %v1258_v25, %v1490_v36  ;;  %vm451_vm14 = vcmp.eq.s32.totalorder %v1260_v26, %v1490_v36 }
  0xe7   :  { %1032 = vset.pattern.permute.xlu1 %v1097_v42  ;;  %479 = vperm.xlu0 %1025, %v1292_v29   ;;  %905 = vst.msk [vmem:[%s1649_s3 + $0x20] sm:$0xff] %vm858_vm10, %v1315_v41  ;;  %vm371_vm3 = vmand %vm347_vm1, %vm367_vm2  ;;  %vm346_vm4 = vcmp.gt.f32.partialorder %v1315_v41, 0.0  ;;  %vm450_vm1 = vcmp.eq.s32.totalorder %v1318_v24, %v1490_v36 }
  0xe8   :  { %475 = vperm.xlu1 %1032, %v1297_v34   ;;  %v393_v61 = vsel %vm371_vm3, 1, %v1083_v2  ;;  %vm370_vm6 = vmand %vm346_vm4, %vm366_vm5  ;;  %vm511_vm4 = vcmp.eq.s32.totalorder %v1262_v11, %v1490_v36 }
  0xe9   :  { %v392_v18 = vsel %vm370_vm6, 1, %v1083_v2 }
  0xea   :  { %v1411_v7 = vpop.permute.xlu1 %628 }
  0xeb   :  { %1026 = vset.pattern.permute.xlu0 %v1098_v13 }
  0xec   :  { %1033 = vset.pattern.permute.xlu1 %v1098_v13  ;;  %539 = vperm.xlu0 %1026, %v1292_v29  }
  0xed   :  { %535 = vperm.xlu1 %1033, %v1297_v34  }
  0xee   :  { %v1418_v57 = vpop.permute.xlu1 %679 }
  0xf0   :  { %1027 = vset.pattern.permute.xlu0 %v1099_v43 }
  0xf1   :  { %1034 = vset.pattern.permute.xlu1 %v1099_v43  ;;  %599 = vperm.xlu0 %1027, %v1292_v29  }
  0xf2   :  { %595 = vperm.xlu1 %1034, %v1297_v34   ;;  %v1424_v58 = vpop.permute.xlu1 %685 }
  0xf5   :  { %1028 = vset.pattern.permute.xlu0 %v1100_v45 }
  0xf6   :  { %1035 = vset.pattern.permute.xlu1 %v1100_v45  ;;  %659 = vperm.xlu0 %1028, %v1292_v29   ;;  %v1430_v59 = vpop.permute.xlu1 %688 }
  0xf7   :  { %655 = vperm.xlu1 %1035, %v1297_v34  }
  0xfa   :  { %1029 = vset.pattern.permute.xlu0 %v1101_v47  ;;  %v1438_v60 = vpop.permute.xlu1 %739 }
  0xfb   :  { %1036 = vset.pattern.permute.xlu1 %v1101_v47  ;;  %719 = vperm.xlu0 %1029, %v1292_v29  }
  0xfc   :  { %715 = vperm.xlu1 %1036, %v1297_v34  }
  0xfe   :  { %v1445_v62 = vpop.permute.xlu1 %745 }
  0xff   :  { %1030 = vset.pattern.permute.xlu0 %v1102_v50 }
 0x100   :  { %1037 = vset.pattern.permute.xlu1 %v1102_v50  ;;  %779 = vperm.xlu0 %1030, %v1292_v29  }
 0x101   :  { %775 = vperm.xlu1 %1037, %v1297_v34  }
 0x102   :  { %v1453_v63 = vpop.permute.xlu1 %748 }
 0x104   :  { %1045 = vset.pattern.permute.xlu0 %v1085_v14 }
 0x105   :  { %1038 = vset.pattern.permute.xlu1 %v1085_v14  ;;  %395 = vperm.xlu0 %1045, %v1367_v51  }
 0x106   :  { %398 = vperm.xlu1 %1038, %v1374_v35   ;;  %v1457_v40 = vpop.permute.xlu1 %799 }
 0x109   :  { %431 = vperm.xlu0 %1045, %v1312_v38  }
 0x10a   :  { %1039 = vset.pattern.permute.xlu1 %v1097_v42  ;;  %v1462_v2 = vpop.permute.xlu1 %805 }
 0x10b   :  { %458 = vperm.xlu1 %1039, %v1374_v35  }
 0x10d   :  { %1046 = vset.pattern.permute.xlu0 %v1097_v42 }
 0x10e   :  { %455 = vperm.xlu0 %1046, %v1367_v51  }
 0x10f   :  { %1040 = vset.pattern.permute.xlu1 %v1098_v13 }
 0x110   :  { %518 = vperm.xlu1 %1040, %v1374_v35  }
 0x112   :  { %487 = vperm.xlu0 %1046, %v1312_v38  }
 0x114   :  { %1041 = vset.pattern.permute.xlu1 %v1099_v43 }
 0x115   :  { %578 = vperm.xlu1 %1041, %v1374_v35  }
 0x116   :  { %1047 = vset.pattern.permute.xlu0 %v1098_v13 }
 0x117   :  { %515 = vperm.xlu0 %1047, %v1367_v51  }
 0x119   :  { %1042 = vset.pattern.permute.xlu1 %v1100_v45 }
 0x11a   :  { %638 = vperm.xlu1 %1042, %v1374_v35  }
 0x11b   :  { %547 = vperm.xlu0 %1047, %v1312_v38  }
 0x11e   :  { %1043 = vset.pattern.permute.xlu1 %v1101_v47 }
 0x11f   :  { %698 = vperm.xlu1 %1043, %v1374_v35   ;;  %1048 = vset.pattern.permute.xlu0 %v1099_v43 }
 0x120   :  { %575 = vperm.xlu0 %1048, %v1367_v51  }
 0x123   :  { %1044 = vset.pattern.permute.xlu1 %v1102_v50 }
 0x124   :  { %758 = vperm.xlu1 %1044, %v1374_v35   ;;  %607 = vperm.xlu0 %1048, %v1312_v38  }
 0x128   :  { %1052 = vset.pattern.permute.xlu1 %v1085_v14  ;;  %1049 = vset.pattern.permute.xlu0 %v1100_v45 }
 0x129   :  { %426 = vperm.xlu1 %1052, %v1315_v41   ;;  %635 = vperm.xlu0 %1049, %v1367_v51  }
 0x12d   :  { %1053 = vset.pattern.permute.xlu1 %v1097_v42  ;;  %667 = vperm.xlu0 %1049, %v1312_v38  }
 0x12e   :  { %483 = vperm.xlu1 %1053, %v1315_v41  }
 0x131   :  { %1050 = vset.pattern.permute.xlu0 %v1101_v47 }
 0x132   :  { %1054 = vset.pattern.permute.xlu1 %v1098_v13  ;;  %695 = vperm.xlu0 %1050, %v1367_v51  }
 0x133   :  { %543 = vperm.xlu1 %1054, %v1315_v41  }
 0x136   :  { %727 = vperm.xlu0 %1050, %v1312_v38  }
 0x137   :  { %1055 = vset.pattern.permute.xlu1 %v1099_v43 }
 0x138   :  { %603 = vperm.xlu1 %1055, %v1315_v41  }
 0x13a   :  { %1051 = vset.pattern.permute.xlu0 %v1102_v50 }
 0x13b   :  { %755 = vperm.xlu0 %1051, %v1367_v51  }
 0x13c   :  { %1056 = vset.pattern.permute.xlu1 %v1100_v45 }
 0x13d   :  { %663 = vperm.xlu1 %1056, %v1315_v41  }
 0x13f   :  { %787 = vperm.xlu0 %1051, %v1312_v38  }
 0x141   :  { %1057 = vset.pattern.permute.xlu1 %v1101_v47 }
 0x142   :  { %723 = vperm.xlu1 %1057, %v1315_v41  }
 0x143   :  { %1059 = vset.pattern.permute.xlu0 %v1085_v14 }
 0x144   :  { %404 = vperm.xlu0 %1059, %v393_v61  }
 0x146   :  { %1058 = vset.pattern.permute.xlu1 %v1102_v50 }
 0x147   :  { %783 = vperm.xlu1 %1058, %v1315_v41  }
 0x148   :  { %1060 = vset.pattern.permute.xlu0 %v1097_v42 }
 0x149   :  { %464 = vperm.xlu0 %1060, %v393_v61  }
 0x14b   :  { %1067 = vset.pattern.permute.xlu1 %v1085_v14  ;;  %v1466_v14 = vpop.permute.xlu1 %808 }
 0x14c   :  { %401 = vperm.xlu1 %1067, %v392_v18  }
 0x14d   :  { %1061 = vset.pattern.permute.xlu0 %v1098_v13 }
 0x14e   :  { %524 = vperm.xlu0 %1061, %v393_v61  }
 0x150   :  { %1068 = vset.pattern.permute.xlu1 %v1097_v42 }
 0x151   :  { %461 = vperm.xlu1 %1068, %v392_v18  }
 0x152   :  { %1062 = vset.pattern.permute.xlu0 %v1099_v43 }
 0x153   :  { %584 = vperm.xlu0 %1062, %v393_v61  }
 0x155   :  { %1069 = vset.pattern.permute.xlu1 %v1098_v13 }
 0x156   :  { %521 = vperm.xlu1 %1069, %v392_v18  }
 0x157   :  { %1063 = vset.pattern.permute.xlu0 %v1100_v45 }
 0x158   :  { %644 = vperm.xlu0 %1063, %v393_v61  }
 0x15a   :  { %1070 = vset.pattern.permute.xlu1 %v1099_v43 }
 0x15b   :  { %581 = vperm.xlu1 %1070, %v392_v18  }
 0x15c   :  { %1064 = vset.pattern.permute.xlu0 %v1101_v47 }
 0x15d   :  { %704 = vperm.xlu0 %1064, %v393_v61  }
 0x15f   :  { %1071 = vset.pattern.permute.xlu1 %v1100_v45 }
 0x160   :  { %641 = vperm.xlu1 %1071, %v392_v18  }
 0x161   :  { %1065 = vset.pattern.permute.xlu0 %v1102_v50  ;;  %v422_v21 = vpop.permute.xlu0 %421 }
 0x162   :  { %v417_v0 = vpop.permute.xlu1 %416  ;;  %764 = vperm.xlu0 %1065, %v393_v61  }
 0x164   :  { %1072 = vset.pattern.permute.xlu1 %v1101_v47 }
 0x165   :  { %701 = vperm.xlu1 %1072, %v392_v18  }
 0x166   :  { %1066 = vset.pattern.permute.xlu0 %v1103_v1  ;;  %v480_v3 = vpop.permute.xlu0 %479 }
 0x167   :  { %v476_v4 = vpop.permute.xlu1 %475  ;;  %815 = vperm.xlu0 %1066, %v1367_v51  }
 0x169   :  { %1073 = vset.pattern.permute.xlu1 %v1102_v50 }
 0x16a   :  { %761 = vperm.xlu1 %1073, %v392_v18  }
 0x16b   :  { %824 = vperm.xlu0 %1066, %v393_v61   ;;  %v540_v5 = vpop.permute.xlu0 %539 }
 0x16c   :  { %v536_v6 = vpop.permute.xlu1 %535 }
 0x16e   :  { %1074 = vset.pattern.permute.xlu1 %v1103_v1 }
 0x16f   :  { %818 = vperm.xlu1 %1074, %v1374_v35   ;;  %839 = vperm.xlu0 %1066, %v1292_v29  }
 0x170   :  { %v600_v8 = vpop.permute.xlu0 %599 }
 0x171   :  { %v1475_v9 = vpop.permute.xlu1 %595 }
 0x173   :  { %821 = vperm.xlu1 %1074, %v392_v18   ;;  %847 = vperm.xlu0 %1066, %v1312_v38  }
 0x175   :  { %v660_v15 = vpop.permute.xlu0 %659 }
 0x176   :  { %v1478_v17 = vpop.permute.xlu1 %655 }
 0x177   :  { %835 = vperm.xlu1 %1074, %v1297_v34  }
 0x17a   :  { %v1481_v19 = vpop.permute.xlu0 %719 }
 0x17b   :  { %843 = vperm.xlu1 %1074, %v1315_v41   ;;  %v1484_v20 = vpop.permute.xlu1 %715 }
 0x17f   :  { %v1486_v31 = vpop.permute.xlu0 %779 }
 0x180   :  { %v1488_v29 = vpop.permute.xlu1 %775 }
 0x184   :  { %v396_v39 = vpop.permute.xlu0 %395 }
 0x185   :  { %vm406_vm8 = vcmp.eq.s32.totalorder %v396_v39, 1  ;;  %v399_v38 = vpop.permute.xlu1 %398 }
 0x186   :  { %vm1496_vm11 = vmand %vm406_vm8, %vm386_vm7  ;;  %vm407_vm12 = vcmp.eq.s32.totalorder %v399_v38, 1  ;;  %vm571_vm7 = vcmp.eq.s32.totalorder %v1264_v27, %v1490_v36 }
 0x187   :  { %v434_v41 = vsel %vm1496_vm11, %v417_v0, 0.0  ;;  %vm411_vm13 = vmand %vm407_vm12, %vm387_vm9  ;;  %vm510_vm11 = vcmp.eq.s32.totalorder %v1349_v46, %v1490_v36 }
 0x188   :  { %v435_v42 = vsel %vm411_vm13, %v422_v21, 0.0  ;;  %v1502_v13 = vpop.permute.xlu0 %431 }
 0x18a   :  { %v459_v43 = vpop.permute.xlu1 %458 }
 0x18b   :  { %vm467_vm15 = vcmp.eq.s32.totalorder %v459_v43, 1 }
 0x18c   :  { %vm471_vm0 = vmand %vm467_vm15, %vm451_vm14  ;;  %vm631_vm14 = vcmp.eq.s32.totalorder %v1266_v28, %v1490_v36 }
 0x18d   :  { %v491_v48 = vsel %vm471_vm0, %v480_v3, 0.0  ;;  %v456_v25 = vpop.permute.xlu0 %455 }
 0x18e   :  { %v495_v45 = vmax.f32 %v435_v42, %v491_v48  ;;  %vm466_vm2 = vcmp.eq.s32.totalorder %v456_v25, 1 }
 0x18f   :  { %vm470_vm3 = vmand %vm466_vm2, %vm450_vm1  ;;  %v519_v47 = vpop.permute.xlu1 %518  ;;  %vm691_vm1 = vcmp.eq.s32.totalorder %v1268_v10, %v1490_v36 }
 0x190   :  { %v490_v50 = vsel %vm470_vm3, %v476_v4, 0.0  ;;  %vm527_vm5 = vcmp.eq.s32.totalorder %v519_v47, 1  ;;  %vm570_vm3 = vcmp.eq.s32.totalorder %v1379_v16, %v1490_v36 }
 0x191   :  { %v494_v51 = vmax.f32 %v434_v41, %v490_v50  ;;  %vm531_vm6 = vmand %vm527_vm5, %vm511_vm4  ;;  %v1510_v35 = vpop.permute.xlu0 %487 }
 0x192   :  { %v551_v26 = vsel %vm531_vm6, %v540_v5, 0.0 }
 0x193   :  { %v555_v61 = vmax.f32 %v495_v45, %v551_v26 }
 0x194   :  { %v579_v18 = vpop.permute.xlu1 %578 }
 0x195   :  { %vm587_vm8 = vcmp.eq.s32.totalorder %v579_v18, 1 }
 0x196   :  { %vm591_vm9 = vmand %vm587_vm8, %vm571_vm7  ;;  %v516_v24 = vpop.permute.xlu0 %515  ;;  %vm751_vm7 = vcmp.eq.s32.totalorder %v1272_v32, %v1490_v36 }
 0x197   :  { %v611_v21 = vsel %vm591_vm9, %v600_v8, 0.0  ;;  %vm526_vm12 = vcmp.eq.s32.totalorder %v516_v24, 1 }
 0x198   :  { %v615_v11 = vmax.f32 %v555_v61, %v611_v21  ;;  %vm530_vm13 = vmand %vm526_vm12, %vm510_vm11  ;;  %vm630_vm11 = vcmp.eq.s32.totalorder %v1398_v55, %v1490_v36 }
 0x199   :  { %v550_v0 = vsel %vm530_vm13, %v536_v6, 0.0  ;;  %v639_v1 = vpop.permute.xlu1 %638 }
 0x19a   :  { %v554_v3 = vmax.f32 %v494_v51, %v550_v0  ;;  %vm647_vm15 = vcmp.eq.s32.totalorder %v639_v1, 1  ;;  %v1518_v4 = vpop.permute.xlu0 %547 }
 0x19b   :  { %vm651_vm0 = vmand %vm647_vm15, %vm631_vm14  ;;  %vm690_vm14 = vcmp.eq.s32.totalorder %v1418_v57, %v1490_v36 }
 0x19c   :  { %v671_v27 = vsel %vm651_vm0, %v660_v15, 0.0 }
 0x19d   :  { %v675_v5 = vmax.f32 %v615_v11, %v671_v27 }
 0x19e   :  { %v699_v23 = vpop.permute.xlu1 %698 }
 0x19f   :  { %vm707_vm2 = vcmp.eq.s32.totalorder %v699_v23, 1  ;;  %v576_v46 = vpop.permute.xlu0 %575 }
 0x1a0   :  { %vm711_vm4 = vmand %vm707_vm2, %vm691_vm1  ;;  %vm586_vm5 = vcmp.eq.s32.totalorder %v576_v46, 1  ;;  %vm750_vm1 = vcmp.eq.s32.totalorder %v1438_v60, %v1490_v36 }
 0x1a1   :  { %v731_v28 = vsel %vm711_vm4, %v1481_v19, 0.0  ;;  %vm590_vm6 = vmand %vm586_vm5, %vm570_vm3  ;;  %vm389_vm5 = vcmp.eq.s32.totalorder %v1294_v33, %v1490_v36 }
 0x1a2   :  { %v735_v6 = vmax.f32 %v675_v5, %v731_v28  ;;  %v610_v8 = vsel %vm590_vm6, %v1475_v9, 0.0 }
 0x1a3   :  { %v614_v39 = vmax.f32 %v554_v3, %v610_v8  ;;  %v759_v15 = vpop.permute.xlu1 %758  ;;  %v1526_v38 = vpop.permute.xlu0 %607 }
 0x1a4   :  { %vm767_vm8 = vcmp.eq.s32.totalorder %v759_v15, 1 }
 0x1a5   :  { %vm771_vm9 = vmand %vm767_vm8, %vm751_vm7  ;;  %vm453_vm7 = vcmp.eq.s32.totalorder %v1343_v44, %v1490_v36 }
 0x1a6   :  { %v791_v10 = vsel %vm771_vm9, %v1486_v31, 0.0 }
 0x1a7   :  { %v1531_v16 = vpop.f32.mrb[0].mxu1  ;;  %v1533_v34 = vmax.f32 %v735_v6, %v791_v10 }
 0x1a8   :  { %v1535_v19 = vpop.permute.xlu1 %426  ;;  %v636_v41 = vpop.permute.xlu0 %635 }
 0x1a9   :  { %vm646_vm12 = vcmp.eq.s32.totalorder %v636_v41, 1  ;;  %v959_v9 = vpop.f32.mrb[1].mxu1 }
 0x1aa   :  { %vm650_vm13 = vmand %vm646_vm12, %vm630_vm11  ;;  %vm513_vm11 = vcmp.eq.s32.totalorder %v1369_v52, %v1490_v36 }
 0x1ab   :  { %v670_v42 = vsel %vm650_vm13, %v1478_v17, 0.0 }
 0x1ac   :  { %v674_v32 = vmax.f32 %v614_v39, %v670_v42  ;;  %v1540_v43 = vpop.permute.xlu0 %667 }
 0x1ad   :  { %v1542_v48 = vpop.permute.xlu1 %483 }
 0x1b1   :  { %v696_v31 = vpop.permute.xlu0 %695 }
 0x1b2   :  { %vm706_vm15 = vcmp.eq.s32.totalorder %v696_v31, 1  ;;  %v1546_v25 = vpop.permute.xlu1 %543 }
 0x1b3   :  { %vm710_vm0 = vmand %vm706_vm15, %vm690_vm14  ;;  %vm452_vm15 = vcmp.eq.s32.totalorder %v1336_v30, %v1490_v36 }
 0x1b4   :  { %v730_v55 = vsel %vm710_vm0, %v1484_v20, 0.0  ;;  %vm573_vm0 = vcmp.eq.s32.totalorder %v1392_v54, %v1490_v36 }
 0x1b5   :  { %v734_v45 = vmax.f32 %v674_v32, %v730_v55  ;;  %v1549_v47 = vpop.permute.xlu0 %727 }
 0x1b7   :  { %v1551_v50 = vpop.permute.xlu1 %603 }
 0x1ba   :  { %v756_v17 = vpop.permute.xlu0 %755 }
 0x1bb   :  { %vm766_vm2 = vcmp.eq.s32.totalorder %v756_v17, 1 }
 0x1bc   :  { %vm770_vm3 = vmand %vm766_vm2, %vm750_vm1  ;;  %v1555_v51 = vpop.permute.xlu1 %663 }
 0x1bd   :  { %v790_v57 = vsel %vm770_vm3, %v1488_v29, 0.0 }
 0x1be   :  { %v1558_v26 = vpop.permute.xlu0 %787  ;;  %v1560_v61 = vmax.f32 %v734_v45, %v790_v57 }
 0x1c1   :  { %v1562_v20 = vpop.permute.xlu1 %723 }
 0x1c3   :  { %v405_v18 = vpop.permute.xlu0 %404 }
 0x1c4   :  { %vm409_vm4 = vcmp.eq.s32.totalorder %v405_v18, 1 }
 0x1c5   :  { %vm413_vm6 = vmand %vm409_vm4, %vm389_vm5  ;;  %vm388_vm5 = vcmp.eq.s32.totalorder %v1289_v22, %v1490_v36 }
 0x1c6   :  { %v1564_v24 = vpop.permute.xlu1 %783  ;;  %v437_v29 = vsel %vm413_vm6, %v1502_v13, 0.0  ;;  %vm512_vm6 = vcmp.eq.s32.totalorder %v1356_v49, %v1490_v36 }
 0x1c8   :  { %v465_v60 = vpop.permute.xlu0 %464 }
 0x1c9   :  { %vm469_vm8 = vcmp.eq.s32.totalorder %v465_v60, 1 }
 0x1ca   :  { %vm473_vm9 = vmand %vm469_vm8, %vm453_vm7 }
 0x1cb   :  { %v493_v21 = vsel %vm473_vm9, %v1510_v35, 0.0  ;;  %v402_v11 = vpop.permute.xlu1 %401 }
 0x1cc   :  { %v497_v0 = vmax.f32 %v437_v29, %v493_v21  ;;  %vm408_vm1 = vcmp.eq.s32.totalorder %v402_v11, 1 }
 0x1cd   :  { %v525_v1 = vpop.permute.xlu0 %524  ;;  %vm412_vm7 = vmand %vm408_vm1, %vm388_vm5  ;;  %vm693_vm1 = vcmp.eq.s32.totalorder %v1430_v59, %v1490_v36 }
 0x1ce   :  { %vm529_vm12 = vcmp.eq.s32.totalorder %v525_v1, 1  ;;  %v436_v22 = vsel %vm412_vm7, %v1535_v19, 0.0  ;;  %vm753_vm7 = vcmp.eq.s32.totalorder %v1453_v63, %v1490_v36 }
 0x1cf   :  { %vm533_vm13 = vmand %vm529_vm12, %vm513_vm11  ;;  %vm633_vm11 = vcmp.eq.s32.totalorder %v1411_v7, %v1490_v36 }
 0x1d0   :  { %v553_v33 = vsel %vm533_vm13, %v1518_v4, 0.0  ;;  %v462_v3 = vpop.permute.xlu1 %461 }
 0x1d1   :  { %v557_v27 = vmax.f32 %v497_v0, %v553_v33  ;;  %vm468_vm14 = vcmp.eq.s32.totalorder %v462_v3, 1  ;;  %v341_v3 = vadd.f32 %v1531_v16, %v1249_v12 }
 0x1d2   :  { %v585_v44 = vpop.permute.xlu0 %584  ;;  %vm1579_vm2 = vmand %vm468_vm14, %vm452_vm15  ;;  %vm572_vm14 = vcmp.eq.s32.totalorder %v1386_v53, %v1490_v36 }
 0x1d3   :  { %vm589_vm3 = vcmp.eq.s32.totalorder %v585_v44, 1  ;;  %v492_v54 = vsel %vm1579_vm2, %v1542_v48, 0.0 }
 0x1d4   :  { %vm593_vm4 = vmand %vm589_vm3, %vm573_vm0  ;;  %v496_v23 = vmax.f32 %v436_v22, %v492_v54  ;;  %v892_v54 = vrot.slane %v341_v3, 1 }
 0x1d5   :  { %v613_v52 = vsel %vm593_vm4, %v1526_v38, 0.0  ;;  %v522_v35 = vpop.permute.xlu1 %521  ;;  %vm632_vm4 = vcmp.eq.s32.totalorder %v1404_v56, %v1490_v36 }
 0x1d6   :  { %v617_v30 = vmax.f32 %v557_v27, %v613_v52  ;;  %vm528_vm8 = vcmp.eq.s32.totalorder %v522_v35, 1 }
 0x1d7   :  { %vm532_vm9 = vmand %vm528_vm8, %vm512_vm6  ;;  %v645_v4 = vpop.permute.xlu0 %644 }
 0x1d8   :  { %vm649_vm12 = vcmp.eq.s32.totalorder %v645_v4, 1  ;;  %v552_v5 = vsel %vm532_vm9, %v1546_v25, 0.0 }
 0x1d9   :  { %vm653_vm13 = vmand %vm649_vm12, %vm633_vm11  ;;  %v556_v6 = vmax.f32 %v496_v23, %v552_v5  ;;  %vm692_vm11 = vcmp.eq.s32.totalorder %v1424_v58, %v1490_v36  ;;  %v894_v23 = vrot.slane %v341_v3, 3 }
 0x1da   :  { %v673_v49 = vsel %vm653_vm13, %v1540_v43, 0.0  ;;  %v582_v46 = vpop.permute.xlu1 %581 }
 0x1db   :  { %v677_v28 = vmax.f32 %v617_v30, %v673_v49  ;;  %vm588_vm15 = vcmp.eq.s32.totalorder %v582_v46, 1 }
 0x1dc   :  { %vm592_vm0 = vmand %vm588_vm15, %vm572_vm14  ;;  %v705_v8 = vpop.permute.xlu0 %704  ;;  %vm752_vm14 = vcmp.eq.s32.totalorder %v1445_v62, %v1490_v36 }
 0x1dd   :  { %v612_v7 = vsel %vm592_vm0, %v1551_v50, 0.0  ;;  %vm709_vm2 = vcmp.eq.s32.totalorder %v705_v8, 1 }
 0x1de   :  { %v616_v39 = vmax.f32 %v556_v6, %v612_v7  ;;  %vm713_vm3 = vmand %vm709_vm2, %vm693_vm1  ;;  %vm811_vm1 = vcmp.eq.s32.totalorder %v1278_v37, %v1490_v36 }
 0x1df   :  { %v733_v15 = vsel %vm713_vm3, %v1549_v47, 0.0  ;;  %v642_v38 = vpop.permute.xlu1 %641 }
 0x1e0   :  { %v737_v53 = vmax.f32 %v677_v28, %v733_v15  ;;  %vm648_vm5 = vcmp.eq.s32.totalorder %v642_v38, 1  ;;  %v893_v15 = vrot.slane %v341_v3, 2 }
 0x1e1   :  { %vm652_vm6 = vmand %vm648_vm5, %vm632_vm4  ;;  %v765_v10 = vpop.permute.xlu0 %764  ;;  %vm813_vm5 = vcmp.eq.s32.totalorder %v1466_v14, %v1490_v36 }
 0x1e2   :  { %v672_v59 = vsel %vm652_vm6, %v1555_v51, 0.0  ;;  %vm769_vm8 = vcmp.eq.s32.totalorder %v765_v10, 1 }
 0x1e3   :  { %v676_v19 = vmax.f32 %v616_v39, %v672_v59  ;;  %vm773_vm9 = vmand %vm769_vm8, %vm753_vm7  ;;  %vm810_vm8 = vcmp.eq.s32.totalorder %v1457_v40, %v1490_v36 }
 0x1e4   :  { %v793_v41 = vsel %vm773_vm9, %v1558_v26, 0.0  ;;  %v702_v9 = vpop.permute.xlu1 %701 }
 0x1e5   :  { %vm708_vm12 = vcmp.eq.s32.totalorder %v702_v9, 1  ;;  %v797_v56 = vmax.f32 %v737_v53, %v793_v41 }
 0x1e6   :  { %vm712_vm13 = vmand %vm708_vm12, %vm692_vm11  ;;  %v816_v42 = vpop.permute.xlu0 %815  ;;  %vm812_vm12 = vcmp.eq.s32.totalorder %v1462_v2, %v1490_v36 }
 0x1e7   :  { %v732_v32 = vsel %vm712_vm13, %v1562_v20, 0.0  ;;  %vm826_vm7 = vcmp.eq.s32.totalorder %v816_v42, 1 }
 0x1e8   :  { %v736_v43 = vmax.f32 %v676_v19, %v732_v32  ;;  %vm830_vm9 = vmand %vm826_vm7, %vm810_vm8 }
 0x1e9   :  { %v762_v48 = vpop.permute.xlu1 %761 }
 0x1ea   :  { %vm768_vm15 = vcmp.eq.s32.totalorder %v762_v48, 1  ;;  %v825_v63 = vpop.permute.xlu0 %824 }
 0x1eb   :  { %vm772_vm0 = vmand %vm768_vm15, %vm752_vm14  ;;  %vm829_vm2 = vcmp.eq.s32.totalorder %v825_v63, 1  ;;  %vm907_vm14 = vcmask 122880  }
 0x1ec   :  { %v792_v31 = vsel %vm772_vm0, %v1564_v24, 0.0  ;;  %vm833_vm6 = vmand %vm829_vm2, %vm813_vm5 }
 0x1ed   :  { %v796_v25 = vmax.f32 %v736_v43, %v792_v31 }
 0x1ee   :  { %v819_v55 = vpop.permute.xlu1 %818  ;;  %v840_v45 = vpop.permute.xlu0 %839 }
 0x1ef   :  { %vm827_vm3 = vcmp.eq.s32.totalorder %v819_v55, 1 }
 0x1f0   :  { %vm831_vm4 = vmand %vm827_vm3, %vm811_vm1 }
 0x1f1   :  { %v851_v58 = vsel %vm831_vm4, %v840_v45, 0.0 }
 0x1f2   :  { %v855_v62 = vmax.f32 %v1533_v34, %v851_v58  ;;  %v822_v47 = vpop.permute.xlu1 %821  ;;  %v848_v50 = vpop.permute.xlu0 %847 }
 0x1f3   :  { %v853_v17 = vsel %vm833_vm6, %v848_v50, 0.0  ;;  %vm828_vm11 = vcmp.eq.s32.totalorder %v822_v47, 1 }
 0x1f4   :  { %v866_v51 = vsel %vm858_vm10, %v855_v62, -inf  ;;  %v857_v57 = vmax.f32 %v797_v56, %v853_v17  ;;  %vm832_vm13 = vmand %vm828_vm11, %vm812_vm12 }
 0x1f5   :  { %v867_v37 = vrot.slane %v866_v51, 4 }
 0x1f6   :  { %v880_v26 = vsel %vm858_vm10, %v857_v57, -inf  ;;  %v836_v20 = vpop.permute.xlu1 %835 }
 0x1f7   :  { %v868_v14 = vmax.f32 %v866_v51, %v867_v37  ;;  %v881_v18 = vrot.slane %v880_v26, 4  ;;  %v850_v34 = vsel %vm830_vm9, %v836_v20, 0.0 }
 0x1f8   :  { %v854_v24 = vmax.f32 %v1560_v61, %v850_v34 }
 0x1f9   :  { %v869_v60 = vrot.slane %v868_v14, 2  ;;  %v882_v29 = vmax.f32 %v880_v26, %v881_v18 }
 0x1fa   :  { %v859_v21 = vsel %vm858_vm10, %v854_v24, -inf  ;;  %v844_v40 = vpop.permute.xlu1 %843 }
 0x1fb   :  { %v870_v11 = vmax.f32 %v868_v14, %v869_v60  ;;  %v883_v0 = vrot.slane %v882_v29, 2  ;;  %v860_v1 = vrot.slane %v859_v21, 4  ;;  %v852_v33 = vsel %vm832_vm13, %v844_v40, 0.0 }
 0x1fc   :  { %v856_v27 = vmax.f32 %v796_v25, %v852_v33 }
 0x1fd   :  { %v871_v44 = vrot.slane %v870_v11, 1  ;;  %v884_v13 = vmax.f32 %v882_v29, %v883_v0  ;;  %v861_v61 = vmax.f32 %v859_v21, %v860_v1 }
 0x1fe   :  { %v873_v52 = vsel %vm858_vm10, %v856_v27, -inf }
 0x1ff   :  { %v872_v2 = vmax.f32 %v870_v11, %v871_v44  ;;  %v885_v36 = vrot.slane %v884_v13, 1  ;;  %v862_v35 = vrot.slane %v861_v61, 2  ;;  %v874_v30 = vrot.slane %v873_v52, 4 }
 0x201   :  { %vm888_vm15 = vcmp.ne.f32.partialorder %v872_v2, 0.0  ;;  %v886_v4 = vmax.f32 %v884_v13, %v885_v36  ;;  %v863_v22 = vmax.f32 %v861_v61, %v862_v35  ;;  %v875_v5 = vmax.f32 %v873_v52, %v874_v30 }
 0x202   :  { %v900_v49 = vsel %vm888_vm15, %v872_v2, %v892_v54 }
 0x203   :  { %909 = vst.msk [vmem:[%s1649_s3 + $0x18] sm:$0x1] %vm907_vm14, %v900_v49  ;;  %vm890_vm0 = vcmp.ne.f32.partialorder %v886_v4, 0.0  ;;  %v864_v12 = vrot.slane %v863_v22, 1  ;;  %v876_v16 = vrot.slane %v875_v5, 2 }
 0x204   :  { %v902_v46 = vsel %vm890_vm0, %v886_v4, %v894_v23 }
 0x205   :  { %911 = vst.msk [vmem:[%s1649_s3 + $0x38] sm:$0x1] %vm907_vm14, %v902_v46  ;;  %v865_v28 = vmax.f32 %v863_v22, %v864_v12  ;;  %v877_v6 = vmax.f32 %v875_v5, %v876_v16 }
 0x207   :  { %vm887_vm10 = vcmp.ne.f32.partialorder %v865_v28, 0.0  ;;  %v878_v8 = vrot.slane %v877_v6, 1 }
 0x208   :  { %v899_v7 = vsel %vm887_vm10, %v865_v28, %v341_v3 }
 0x209   :  { %908 = vst.msk [vmem:[%s1649_s3 + $0x8] sm:$0x1] %vm907_vm14, %v899_v7  ;;  %v879_v39 = vmax.f32 %v877_v6, %v878_v8 }
 0x20b   :  { %vm889_vm1 = vcmp.ne.f32.partialorder %v879_v39, 0.0 }
 0x20c   :  { %v901_v38 = vsel %vm889_vm1, %v879_v39, %v893_v15 }
 0x20d   :  { %910 = vst.msk [vmem:[%s1649_s3 + $0x28] sm:$0x1] %vm907_vm14, %v901_v38 }

</bundles_post_ra>
